<compile_context>
chip_gen: v7x
topology: tpu7x:2x2x1
jax: 0.10.0
libtpu: 0.0.40
codegen_flags: <defaults>
</compile_context>

<pallas_src>
import jax
import jax.numpy as jnp
from jax.experimental import pallas as pl
from jax.experimental.pallas import tpu as pltpu


HIDDEN = 2048          # resnet50 pooled feature size
FEATURE_DIM = 128      # self.refactor out_features
NUM_CLASSES = 128      # self.fc out_features
LN_EPS = 1e-5          # F.layer_norm default
L2_EPS = 1e-12         # F.normalize default


def head_kernel(x_ref, wrt_ref, br_ref, wfct_ref, feat_ref, cls_ref):
    # ---- LayerNorm over last dim (no affine, eps=1e-5) ----
    x = x_ref[...].astype(jnp.float32)                        # [B, H]
    mean = jnp.mean(x, axis=-1, keepdims=True)
    var = jnp.mean(jnp.square(x - mean), axis=-1, keepdims=True)
    xn = (x - mean) * jax.lax.rsqrt(var + LN_EPS)

    # ---- refactor: y = xn @ Wr_t + b   (Wr_t is pre-transposed [H, F]) ----
    wrt = wrt_ref[...].astype(jnp.float32)                    # [H, F]
    br = br_ref[...].astype(jnp.float32)                      # [1, F]
    y = jnp.dot(xn, wrt, preferred_element_type=jnp.float32) + br   # [B, F]

    # ---- feature = L2-normalize(y, dim=-1) via rsqrt (EUP path) ----
    # rsqrt(max(sum(y^2), eps^2)) == 1 / max(||y||, eps)  (matches F.normalize)
    inv_norm = jax.lax.rsqrt(
        jnp.maximum(jnp.sum(y * y, axis=-1, keepdims=True), L2_EPS * L2_EPS))
    feat = y * inv_norm                                       # [B, F]
    feat_ref[...] = feat.astype(feat_ref.dtype)

    # ---- ProxyLinear: classes = feat @ normalize(Wfc, dim=-1)^T ----
    # Wfc_t is pre-transposed [F, C]; normalizing row i of Wfc == normalizing
    # column i of Wfc_t, which is equivalent to scaling column i of the
    # matmul result.  So scale the tiny [B, C] output instead of the weight.
    wfct = wfct_ref[...].astype(jnp.float32)                  # [F, C]
    w_inv = jax.lax.rsqrt(
        jnp.maximum(jnp.sum(wfct * wfct, axis=0, keepdims=True),
                    L2_EPS * L2_EPS))                         # [1, C]
    cls = jnp.dot(feat, wfct, preferred_element_type=jnp.float32) * w_inv  # [B, C]
    cls_ref[...] = cls.astype(cls_ref.dtype)


def model_head(x, w_refactor, b_refactor, w_fc):
    """x: [B, HIDDEN] pooled features.  Returns (feature [B,F], classes [B,C])."""
    B, H = x.shape
    F_, _ = w_refactor.shape
    C, _ = w_fc.shape

    # Pre-transpose weights once outside the kernel so the MXU consumes them
    # directly ([K, N] layout) and no XLU transposes run in the hot path.
    wrt = jnp.transpose(w_refactor)        # [H, F]
    wfct = jnp.transpose(w_fc)             # [F, C]
    b2d = b_refactor.reshape(1, F_)

    vmem = pl.BlockSpec(memory_space=pltpu.MemorySpace.VMEM)
    feat, cls = pl.pallas_call(
        head_kernel,
        out_shape=(
            jax.ShapeDtypeStruct((B, F_), jnp.float32),
            jax.ShapeDtypeStruct((B, C), jnp.float32),
        ),
        in_specs=[vmem, vmem, vmem, vmem],
        out_specs=(vmem, vmem),
    )(x, wrt, b2d, wfct)
    return feat, cls


def reference_head(x, w_refactor, b_refactor, w_fc):
    """Pure-JAX reference mirroring the PyTorch forward (post-backbone)."""
    mean = jnp.mean(x, axis=-1, keepdims=True)
    var = jnp.mean(jnp.square(x - mean), axis=-1, keepdims=True)
    xn = (x - mean) / jnp.sqrt(var + LN_EPS)
    y = xn @ w_refactor.T + b_refactor
    feat = y / jnp.maximum(jnp.linalg.norm(y, axis=-1, keepdims=True), L2_EPS)
    wn = w_fc / jnp.maximum(jnp.linalg.norm(w_fc, axis=-1, keepdims=True), L2_EPS)
    cls = feat @ wn.T
    return feat, cls


if __name__ == "__main__":
    key = jax.random.PRNGKey(0)
    k_x, k_wr, k_br, k_wfc = jax.random.split(key, 4)

    B = 8
    x = jax.random.normal(k_x, (B, HIDDEN), dtype=jnp.float32)

    # Deterministic parameter init (kaiming-uniform-like uniform ranges).
    bound_r = 1.0 / (HIDDEN ** 0.5)
    w_refactor = jax.random.uniform(
        k_wr, (FEATURE_DIM, HIDDEN), minval=-bound_r, maxval=bound_r,
        dtype=jnp.float32)
    b_refactor = jax.random.uniform(
        k_br, (FEATURE_DIM,), minval=-bound_r, maxval=bound_r, dtype=jnp.float32)
    bound_fc = 1.0 / (FEATURE_DIM ** 0.5)
    w_fc = jax.random.uniform(
        k_wfc, (NUM_CLASSES, FEATURE_DIM), minval=-bound_fc, maxval=bound_fc,
        dtype=jnp.float32)

    feat, cls = model_head(x, w_refactor, b_refactor, w_fc)
    jax.block_until_ready((feat, cls))

    feat_ref, cls_ref = reference_head(x, w_refactor, b_refactor, w_fc)
    assert feat.shape == (B, FEATURE_DIM) and cls.shape == (B, NUM_CLASSES)
    assert jnp.allclose(feat, feat_ref, atol=1e-4, rtol=1e-4)
    assert jnp.allclose(cls, cls_ref, atol=1e-4, rtol=1e-4)

    print("KERNEL_OK")
</pallas_src>

<mosaic_0001>
module attributes {stable_mosaic.version = 11 : i64} {
  func.func @head_kernel(%arg0: memref<8x2048xf32, #tpu.memory_space<vmem>>, %arg1: memref<2048x128xf32, #tpu.memory_space<vmem>>, %arg2: memref<1x128xf32, #tpu.memory_space<vmem>>, %arg3: memref<128x128xf32, #tpu.memory_space<vmem>>, %arg4: memref<8x128xf32, #tpu.memory_space<vmem>>, %arg5: memref<8x128xf32, #tpu.memory_space<vmem>>) attributes {dimension_semantics = [], scalar_prefetch = 0 : i64, scratch_operands = 0 : i64, tpu.core_type = #tpu.core_type<tc>} {
    %c0 = arith.constant 0 : index
    %c0_0 = arith.constant 0 : index
    %0 = vector.load %arg0[%c0, %c0_0] : memref<8x2048xf32, #tpu.memory_space<vmem>>, vector<8x2048xf32>
    %cst = arith.constant dense<0.000000e+00> : vector<8xf32>
    %1 = vector.multi_reduction <add>, %0, %cst [1] : vector<8x2048xf32> to vector<8xf32>
    %2 = vector.shape_cast %1 : vector<8xf32> to vector<8x1xf32>
    %cst_1 = arith.constant 2.048000e+03 : f32
    %3 = vector.broadcast %cst_1 : f32 to vector<8x1xf32>
    %4 = arith.divf %2, %3 : vector<8x1xf32>
    %5 = vector.broadcast %4 : vector<8x1xf32> to vector<8x2048xf32>
    %6 = arith.subf %0, %5 : vector<8x2048xf32>
    %7 = arith.mulf %6, %6 : vector<8x2048xf32>
    %cst_2 = arith.constant dense<0.000000e+00> : vector<8xf32>
    %8 = vector.multi_reduction <add>, %7, %cst_2 [1] : vector<8x2048xf32> to vector<8xf32>
    %9 = vector.shape_cast %8 : vector<8xf32> to vector<8x1xf32>
    %cst_3 = arith.constant 2.048000e+03 : f32
    %10 = vector.broadcast %cst_3 : f32 to vector<8x1xf32>
    %11 = arith.divf %9, %10 : vector<8x1xf32>
    %12 = vector.broadcast %4 : vector<8x1xf32> to vector<8x2048xf32>
    %13 = arith.subf %0, %12 : vector<8x2048xf32>
    %cst_4 = arith.constant 9.99999974E-6 : f32
    %14 = vector.broadcast %cst_4 : f32 to vector<8x1xf32>
    %15 = arith.addf %11, %14 : vector<8x1xf32>
    %16 = math.rsqrt %15 : vector<8x1xf32>
    %17 = vector.broadcast %16 : vector<8x1xf32> to vector<8x2048xf32>
    %18 = arith.mulf %13, %17 : vector<8x2048xf32>
    %c0_5 = arith.constant 0 : index
    %c0_6 = arith.constant 0 : index
    %19 = vector.load %arg1[%c0_5, %c0_6] : memref<2048x128xf32, #tpu.memory_space<vmem>>, vector<2048x128xf32>
    %c0_7 = arith.constant 0 : index
    %c0_8 = arith.constant 0 : index
    %20 = vector.load %arg2[%c0_7, %c0_8] : memref<1x128xf32, #tpu.memory_space<vmem>>, vector<1x128xf32>
    %cst_9 = arith.constant dense<0.000000e+00> : vector<8x128xf32>
    %21 = tpu.matmul %18, %19, %cst_9 {dimension_numbers = #tpu.dot_dimension_numbers<[1], [0], [0], [1], [0, 0, 1, 1], [], []>} : vector<8x2048xf32>, vector<2048x128xf32>, vector<8x128xf32> -> vector<8x128xf32>
    %22 = vector.broadcast %20 : vector<1x128xf32> to vector<8x128xf32>
    %23 = arith.addf %21, %22 : vector<8x128xf32>
    %24 = arith.mulf %23, %23 : vector<8x128xf32>
    %cst_10 = arith.constant dense<0.000000e+00> : vector<8xf32>
    %25 = vector.multi_reduction <add>, %24, %cst_10 [1] : vector<8x128xf32> to vector<8xf32>
    %26 = vector.shape_cast %25 : vector<8xf32> to vector<8x1xf32>
    %cst_11 = arith.constant 1.000000e-24 : f32
    %27 = vector.broadcast %cst_11 : f32 to vector<8x1xf32>
    %28 = arith.maximumf %26, %27 : vector<8x1xf32>
    %29 = math.rsqrt %28 : vector<8x1xf32>
    %30 = vector.broadcast %29 : vector<8x1xf32> to vector<8x128xf32>
    %31 = arith.mulf %23, %30 : vector<8x128xf32>
    %c0_12 = arith.constant 0 : index
    %c0_13 = arith.constant 0 : index
    %32 = vector.load %arg4[%c0_12, %c0_13] : memref<8x128xf32, #tpu.memory_space<vmem>>, vector<8x128xf32>
    tpu.vector_store %arg4[%c0_12, %c0_13], %31 {strides = array<i32>} : memref<8x128xf32, #tpu.memory_space<vmem>>, vector<8x128xf32>,
    %c0_14 = arith.constant 0 : index
    %c0_15 = arith.constant 0 : index
    %33 = vector.load %arg3[%c0_14, %c0_15] : memref<128x128xf32, #tpu.memory_space<vmem>>, vector<128x128xf32>
    %34 = arith.mulf %33, %33 : vector<128x128xf32>
    %cst_16 = arith.constant dense<0.000000e+00> : vector<128xf32>
    %35 = vector.multi_reduction <add>, %34, %cst_16 [0] : vector<128x128xf32> to vector<128xf32>
    %36 = vector.shape_cast %35 : vector<128xf32> to vector<1x128xf32>
    %cst_17 = arith.constant 1.000000e-24 : f32
    %37 = vector.broadcast %cst_17 : f32 to vector<1x128xf32>
    %38 = arith.maximumf %36, %37 : vector<1x128xf32>
    %39 = math.rsqrt %38 : vector<1x128xf32>
    %cst_18 = arith.constant dense<0.000000e+00> : vector<8x128xf32>
    %40 = tpu.matmul %31, %33, %cst_18 {dimension_numbers = #tpu.dot_dimension_numbers<[1], [0], [0], [1], [0, 0, 1, 1], [], []>} : vector<8x128xf32>, vector<128x128xf32>, vector<8x128xf32> -> vector<8x128xf32>
    %41 = vector.broadcast %39 : vector<1x128xf32> to vector<8x128xf32>
    %42 = arith.mulf %40, %41 : vector<8x128xf32>
    %c0_19 = arith.constant 0 : index
    %c0_20 = arith.constant 0 : index
    %43 = vector.load %arg5[%c0_19, %c0_20] : memref<8x128xf32, #tpu.memory_space<vmem>>, vector<8x128xf32>
    tpu.vector_store %arg5[%c0_19, %c0_20], %42 {strides = array<i32>} : memref<8x128xf32, #tpu.memory_space<vmem>>, vector<8x128xf32>,
    return
  }
}

</mosaic_0001>

<bundles_post_ra>
// kernel: tpu_custom_call.1
= control target key start
LH: loop header
LB: loop body
LE: loop exit
PB: predicated region body
PF: predicated region fallthrough
CT: control target
= control target key end

     0   :  { %11 = vsyncpa [#allocation3], 0  ;;  %s2176_s0 = inlined_call_operand.hbm [shape: f32[8,2048], index: 0, kind: input, shape index: {}]   ;;  %s2177_s1 = inlined_call_operand.hbm [shape: f32[2048,128], index: 1, kind: input, shape index: {}]   ;;  %s2178_s2 = inlined_call_operand.vmem [shape: f32[1,128], index: 2, kind: input, shape index: {}]   ;;  %s2179_s3 = inlined_call_operand.hbm [shape: f32[128,128], index: 3, kind: input, shape index: {}]   ;;  %s2180_s4 = inlined_call_operand.hbm [shape: f32[8,128], index: 4, kind: output, shape index: {0}]   ;;  %s2181_s5 = inlined_call_operand.hbm [shape: f32[8,128], index: 5, kind: output, shape index: {1}]  }
   0x1   :  { %12 = vsyncpa [#allocation6], 0 }
   0x2   :  { %13 = vsyncpa [#allocation4], 0 }
   0x3   :  { %14 = vsyncpa [#allocation10], 0  ;;  %s1897_s18 = smov [#allocation5]   ;;  %s1779_s22 = scalar_lea.hbm %s2177_s1, 32768 }
   0x4   :  { %s30_s19 = sshll.u32 %s1897_s18, 4  ;;  %p1780_p0 = scmp.ne.s32.totalorder %s2177_s1, %s1779_s22  ;;  %s31_s19 = int_to_ptr.vmem [resolvable:$true] %s30_s19 }
   0x5   :  { %p1783_p1 = scmp.lt.u32.totalorder %s1779_s22, %s2177_s1 }
   0x7   :  { %p1785_p2 = pnand %p1783_p1, %p1780_p0 }
   0x9   :  { %1788 = shalt.err (!%p1785_p2)
}
   0xa   :  { %s1789_s27 = scalar_lea.vmem %s31_s19, 32768  ;;  %p1794_p4 = scmp.lt.s32.totalorder %s31_s19, %s31_s19 }
   0xb   :  { %p1790_p3 = scmp.ne.s32.totalorder %s31_s19, %s1789_s27  ;;  %p1795_p5 = scmp.lt.s32.totalorder %s1789_s27, %s1789_s27 }
   0xd   :  { %p1796_p6 = por %p1795_p5, %p1794_p4 }
   0xf   :  { %p1797_p7 = pnand %p1796_p6, %p1790_p3 }
  0x11   :  { %1800 = shalt.err (!%p1797_p7)
}
  0x12   :  { %s1898_s28 = smov 128   ;;  %s1899_s29 = smov 8  }
  0x13   :  { %36 = dma.hbm_to_vmem [thread:$0]  %s2177_s1, 32768, %s31_s19, [#allocation6], %s1898_s28, %s1898_s28, %s1899_s29  }
  0x14   :  { %s1900_s7 = smov [#allocation2]   ;;  %s1901_s9 = smov [#allocation7]  }
  0x15   :  { %s21_s8 = sshll.u32 %s1900_s7, 4  ;;  %s44_s10 = sshll.u32 %s1901_s9, 4  ;;  %s22_s8 = int_to_ptr.vmem [resolvable:$true] %s21_s8  ;;  %s45_s10 = int_to_ptr.vmem [resolvable:$true] %s44_s10 }
  0x16   :  { %s1801_s13 = scalar_lea.hbm %s2176_s0, 2048 }
  0x17   :  { %p1802_p8 = scmp.ne.s32.totalorder %s2176_s0, %s1801_s13  ;;  %p1805_p9 = scmp.lt.u32.totalorder %s1801_s13, %s2176_s0 }
  0x19   :  { %p1807_p10 = pnand %p1805_p9, %p1802_p8 }
  0x1b   :  { %1810 = shalt.err (!%p1807_p10)
}
  0x1c   :  { %s1811_s1 = scalar_lea.vmem %s22_s8, 2048  ;;  %p1816_p12 = scmp.lt.s32.totalorder %s22_s8, %s22_s8 }
  0x1d   :  { %p1812_p11 = scmp.ne.s32.totalorder %s22_s8, %s1811_s1  ;;  %p1817_p13 = scmp.lt.s32.totalorder %s1811_s1, %s1811_s1 }
  0x1f   :  { %p1818_p0 = por %p1817_p13, %p1816_p12 }
  0x21   :  { %p1819_p1 = pnand %p1818_p0, %p1812_p11 }
  0x23   :  { %1822 = shalt.err (!%p1819_p1)
}
  0x24   :  { %24 = dma.hbm_to_vmem [thread:$0]  %s2176_s0, 2048, %s22_s8, [#allocation3]  }
  0x25   :  { %s1823_s22 = scalar_lea.hbm %s2179_s3, 2048 }
  0x26   :  { %p1824_p2 = scmp.ne.s32.totalorder %s2179_s3, %s1823_s22  ;;  %p1827_p3 = scmp.lt.u32.totalorder %s1823_s22, %s2179_s3 }
  0x28   :  { %p1829_p4 = pnand %p1827_p3, %p1824_p2 }
  0x2a   :  { %1832 = shalt.err (!%p1829_p4)
}
  0x2b   :  { %s1833_s27 = scalar_lea.vmem %s45_s10, 2048  ;;  %p1838_p6 = scmp.lt.s32.totalorder %s45_s10, %s45_s10 }
  0x2c   :  { %p1834_p5 = scmp.ne.s32.totalorder %s45_s10, %s1833_s27  ;;  %p1839_p7 = scmp.lt.s32.totalorder %s1833_s27, %s1833_s27 }
  0x2e   :  { %p1840_p8 = por %p1839_p7, %p1838_p6 }
  0x30   :  { %p1841_p9 = pnand %p1840_p8, %p1834_p5 }
  0x32   :  { %1844 = shalt.err (!%p1841_p9)
}
  0x33   :  { %50 = dma.hbm_to_vmem [thread:$0]  %s2179_s3, 2048, %s45_s10, [#allocation6], %s1898_s28, %s1898_s28, %s1899_s29  }
  0x34   :  { %1889 = dma.done.wait [#allocation3], 2048  }
  0x35   :  { %1890 = vsyncadd [#allocation3], 4294965248 }
  0x36   :  { %1891 = dma.done.wait [#allocation6], 34816  }
  0x37   :  { %1892 = vsyncadd [#allocation6], 4294932480  ;;  %v1979_v0 = vld [vmem:[#allocation2] sm:$0xff]  ;;  %v1981_v1 = vld [vmem:[#allocation2 + $0x8] sm:$0xff]  ;;  %vm1903_vm0 = vmmov 0  }
  0x38   :  { %v1983_v2 = vld [vmem:[#allocation2 + $0x10] sm:$0xff]  ;;  %v76_v3 = vadd.f32 %v1981_v1, %v1979_v0  ;;  %v1987_v4 = vld [vmem:[#allocation2 + $0x18] sm:$0xff]  ;;  %v1990_v6 = vld [vmem:[#allocation2 + $0x20] sm:$0xff] }
  0x39   :  { %v1993_v8 = vld [vmem:[#allocation2 + $0x28] sm:$0xff]  ;;  %v1996_v10 = vld [vmem:[#allocation2 + $0x30] sm:$0xff]  ;;  %v1999_v12 = vld [vmem:[#allocation2 + $0x38] sm:$0xff] }
  0x3a   :  { %v77_v5 = vadd.f32 %v76_v3, %v1983_v2  ;;  %v2002_v14 = vld [vmem:[#allocation2 + $0x40] sm:$0xff]  ;;  %v2005_v16 = vld [vmem:[#allocation2 + $0x48] sm:$0xff]  ;;  %v2008_v18 = vld [vmem:[#allocation2 + $0x50] sm:$0xff] }
  0x3b   :  { %v2011_v20 = vld [vmem:[#allocation2 + $0x58] sm:$0xff]  ;;  %v2014_v22 = vld [vmem:[#allocation2 + $0x60] sm:$0xff]  ;;  %v2017_v24 = vld [vmem:[#allocation2 + $0x68] sm:$0xff] }
  0x3c   :  { %v78_v7 = vadd.f32 %v77_v5, %v1987_v4  ;;  %v2020_v26 = vld [vmem:[#allocation2 + $0x70] sm:$0xff]  ;;  %v2023_v28 = vld [vmem:[#allocation2 + $0x78] sm:$0xff]  ;;  %v179_v31 = vld [vmem:[#allocation5 + $0x80] sm:$0xff] }
  0x3d   :  { %v180_v32 = vld [vmem:[#allocation5 + $0x88] sm:$0xff]  ;;  %v211_v33 = vld [vmem:[#allocation5 + $0x180] sm:$0xff]  ;;  %v181_v42 = vld [vmem:[#allocation5 + $0x90] sm:$0xff] }
  0x3e   :  { %v79_v9 = vadd.f32 %v78_v7, %v1990_v6  ;;  %v1483_v34 = vpack.c.bf16 %v180_v32, %v179_v31  ;;  %v212_v35 = vld [vmem:[#allocation5 + $0x188] sm:$0xff]  ;;  %v163_v36 = vld [vmem:[#allocation5] sm:$0xff]  ;;  %v182_v44 = vld [vmem:[#allocation5 + $0x98] sm:$0xff] }
  0x3f   :  { %v164_v37 = vld [vmem:[#allocation5 + $0x8] sm:$0xff]  ;;  %v1515_v38 = vpack.c.bf16 %v212_v35, %v211_v33  ;;  %v195_v40 = vld [vmem:[#allocation5 + $0x100] sm:$0xff]  ;;  %v213_v45 = vld [vmem:[#allocation5 + $0x190] sm:$0xff]  ;;  %v1487_v47 = vpack.c.bf16 %v182_v44, %v181_v42 }
  0x40   :  { %v80_v11 = vadd.f32 %v79_v9, %v1993_v8  ;;  %v1485_v39 = vpack.c.bf16 %v164_v37, %v163_v36  ;;  %v196_v41 = vld [vmem:[#allocation5 + $0x108] sm:$0xff]  ;;  %1484 = vmatprep.subr.bf16.mxu0 %v1483_v34  ;;  %v214_v46 = vld [vmem:[#allocation5 + $0x198] sm:$0xff]  ;;  %v165_v49 = vld [vmem:[#allocation5 + $0x10] sm:$0xff] }
  0x41   :  { %v1517_v43 = vpack.c.bf16 %v196_v41, %v195_v40  ;;  %1516 = vmatprep.subr.bf16.mxu1 %v1515_v38  ;;  %v1519_v48 = vpack.c.bf16 %v214_v46, %v213_v45  ;;  %v166_v50 = vld [vmem:[#allocation5 + $0x18] sm:$0xff]  ;;  %v197_v51 = vld [vmem:[#allocation5 + $0x110] sm:$0xff]  ;;  %v183_v54 = vld [vmem:[#allocation5 + $0xa0] sm:$0xff] }
  0x42   :  { %v81_v13 = vadd.f32 %v80_v11, %v1996_v10  ;;  %1486 = vmatpush3.bf16.msra.mxu0 %v1485_v39  ;;  %v1489_v52 = vpack.c.bf16 %v166_v50, %v165_v49  ;;  %v198_v53 = vld [vmem:[#allocation5 + $0x118] sm:$0xff]  ;;  %v184_v55 = vld [vmem:[#allocation5 + $0xa8] sm:$0xff]  ;;  %v215_v58 = vld [vmem:[#allocation5 + $0x1a0] sm:$0xff] }
  0x43   :  { %1518 = vmatpush3.bf16.msra.mxu1 %v1517_v43  ;;  %1488 = vmatprep.subr.bf16.mxu0 %v1487_v47  ;;  %v1521_v56 = vpack.c.bf16 %v198_v53, %v197_v51  ;;  %v1491_v57 = vpack.c.bf16 %v184_v55, %v183_v54  ;;  %v216_v59 = vld [vmem:[#allocation5 + $0x1a8] sm:$0xff]  ;;  %v167_v60 = vld [vmem:[#allocation5 + $0x20] sm:$0xff]  ;;  %v185_v7 = vld [vmem:[#allocation5 + $0xb0] sm:$0xff] }
  0x44   :  { %v82_v15 = vadd.f32 %v81_v13, %v1999_v12  ;;  %1520 = vmatprep.subr.bf16.mxu1 %v1519_v48  ;;  %v1523_v61 = vpack.c.bf16 %v216_v59, %v215_v58  ;;  %v168_v62 = vld [vmem:[#allocation5 + $0x28] sm:$0xff]  ;;  %v199_v63 = vld [vmem:[#allocation5 + $0x120] sm:$0xff]  ;;  %v186_v9 = vld [vmem:[#allocation5 + $0xb8] sm:$0xff] }
  0x45   :  { %v200_v3 = vld [vmem:[#allocation5 + $0x128] sm:$0xff]  ;;  %v1493_v5 = vpack.c.bf16 %v168_v62, %v167_v60  ;;  %v217_v11 = vld [vmem:[#allocation5 + $0x1b0] sm:$0xff] }
  0x46   :  { %v83_v17 = vadd.f32 %v82_v15, %v2002_v14  ;;  %1490 = vmatpush3.bf16.msra.mxu0 %v1489_v52  ;;  %v1525_v13 = vpack.c.bf16 %v200_v3, %v199_v63  ;;  %v1495_v15 = vpack.c.bf16 %v186_v9, %v185_v7  ;;  %v188_v7 = vld [vmem:[#allocation5 + $0xc8] sm:$0xff]  ;;  %v219_v9 = vld [vmem:[#allocation5 + $0x1c0] sm:$0xff] }
  0x47   :  { %1522 = vmatpush3.bf16.msra.mxu1 %v1521_v56  ;;  %1492 = vmatprep.subr.bf16.mxu0 %v1491_v57 }
  0x48   :  { %v84_v19 = vadd.f32 %v83_v17, %v2005_v16  ;;  %v218_v17 = vld [vmem:[#allocation5 + $0x1b8] sm:$0xff]  ;;  %1524 = vmatprep.subr.bf16.mxu1 %v1523_v61 }
  0x4a   :  { %v85_v21 = vadd.f32 %v84_v19, %v2008_v18  ;;  %v169_v19 = vld [vmem:[#allocation5 + $0x30] sm:$0xff]  ;;  %1494 = vmatpush3.bf16.msra.mxu0 %v1493_v5  ;;  %v187_v5 = vld [vmem:[#allocation5 + $0xc0] sm:$0xff] }
  0x4b   :  { %1526 = vmatpush3.bf16.msra.mxu1 %v1525_v13  ;;  %1496 = vmatprep.subr.bf16.mxu0 %v1495_v15  ;;  %v171_v13 = vld [vmem:[#allocation5 + $0x40] sm:$0xff]  ;;  %v172_v15 = vld [vmem:[#allocation5 + $0x48] sm:$0xff] }
  0x4c   :  { %v86_v23 = vadd.f32 %v85_v21, %v2011_v20  ;;  %v170_v21 = vld [vmem:[#allocation5 + $0x38] sm:$0xff] }
  0x4e   :  { %v87_v25 = vadd.f32 %v86_v23, %v2014_v22  ;;  %v1527_v23 = vpack.c.bf16 %v218_v17, %v217_v11  ;;  %v1499_v11 = vpack.c.bf16 %v188_v7, %v187_v5  ;;  %v243_v5 = vld [vmem:[#allocation5 + $0x280] sm:$0xff]  ;;  %v244_v7 = vld [vmem:[#allocation5 + $0x288] sm:$0xff] }
  0x50   :  { %v88_v27 = vadd.f32 %v87_v25, %v2017_v24  ;;  %v201_v25 = vld [vmem:[#allocation5 + $0x130] sm:$0xff]  ;;  %1528 = vmatprep.subr.bf16.mxu1 %v1527_v23  ;;  %v204_v23 = vld [vmem:[#allocation5 + $0x148] sm:$0xff] }
  0x52   :  { %v89_v29 = vadd.f32 %v88_v27, %v2020_v26  ;;  %v202_v27 = vld [vmem:[#allocation5 + $0x138] sm:$0xff] }
  0x54   :  { %v90_v30 = vadd.f32 %v89_v29, %v2023_v28  ;;  %v1497_v29 = vpack.c.bf16 %v170_v21, %v169_v19  ;;  %v1501_v19 = vpack.c.bf16 %v172_v15, %v171_v13  ;;  %v203_v21 = vld [vmem:[#allocation5 + $0x140] sm:$0xff] }
  0x56   :  { %91 = vadd.xlane.f32.xlu0 %v90_v30  ;;  %v1529_v30 = vpack.c.bf16 %v202_v27, %v201_v25  ;;  %1498 = vmatpush3.bf16.msra.mxu0 %v1497_v29  ;;  %v1533_v25 = vpack.c.bf16 %v204_v23, %v203_v21  ;;  %v189_v27 = vld [vmem:[#allocation5 + $0xd0] sm:$0xff]  ;;  %v190_v29 = vld [vmem:[#allocation5 + $0xd8] sm:$0xff]  ;;  %v227_v21 = vld [vmem:[#allocation5 + $0x200] sm:$0xff] }
  0x57   :  { %1500 = vmatprep.subr.bf16.mxu0 %v1499_v11  ;;  %v1547_v11 = vpack.c.bf16 %v244_v7, %v243_v5  ;;  %v228_v23 = vld [vmem:[#allocation5 + $0x208] sm:$0xff]  ;;  %v265_v5 = vld [vmem:[#allocation5 + $0x330] sm:$0xff]  ;;  %v266_v7 = vld [vmem:[#allocation5 + $0x338] sm:$0xff] }
  0x58   :  { %1530 = vmatpush3.bf16.msra.mxu1 %v1529_v30  ;;  %v221_v30 = vld [vmem:[#allocation5 + $0x1d0] sm:$0xff] }
  0x5a   :  { %1502 = vmatpush3.bf16.msra.mxu0 %v1501_v19 }
  0xe3   :  { %v92_v31 = vpop.xlane.xlu0 %91 }
  0xe4   :  { %v94_v32 = vmul.f32 0.00048828125, %v92_v31  ;;  %v1503_v31 = vpack.c.bf16 %v190_v29, %v189_v27  ;;  %v260_v27 = vld [vmem:[#allocation5 + $0x308] sm:$0xff]  ;;  %v245_v29 = vld [vmem:[#allocation5 + $0x290] sm:$0xff] }
  0xe6   :  { %v2028_v33 = vsub.f32 %v1979_v0, %v94_v32  ;;  %v2031_v34 = vsub.f32 %v1981_v1, %v94_v32  ;;  %v2034_v35 = vsub.f32 %v1983_v2, %v94_v32  ;;  %v2041_v38 = vsub.f32 %v1987_v4, %v94_v32  ;;  %1504 = vmatprep.subr.bf16.mxu0 %v1503_v31 }
  0xe7   :  { %v2044_v39 = vsub.f32 %v1990_v6, %v94_v32  ;;  %v2049_v40 = vsub.f32 %v1993_v8, %v94_v32  ;;  %v2054_v42 = vsub.f32 %v1996_v10, %v94_v32  ;;  %v2059_v6 = vsub.f32 %v1999_v12, %v94_v32 }
  0xe8   :  { %v111_v36 = vmul.f32 %v2028_v33, %v2028_v33  ;;  %v112_v37 = vmul.f32 %v2031_v34, %v2031_v34  ;;  %v113_v0 = vmul.f32 %v2034_v35, %v2034_v35  ;;  %v114_v2 = vmul.f32 %v2041_v38, %v2041_v38 }
  0xe9   :  { %v115_v4 = vmul.f32 %v2044_v39, %v2044_v39  ;;  %v116_v44 = vmul.f32 %v2049_v40, %v2049_v40  ;;  %v2064_v8 = vsub.f32 %v2002_v14, %v94_v32  ;;  %v117_v46 = vmul.f32 %v2054_v42, %v2054_v42 }
  0xea   :  { %v127_v1 = vadd.f32 %v112_v37, %v111_v36  ;;  %v2069_v10 = vsub.f32 %v2005_v16, %v94_v32  ;;  %v118_v48 = vmul.f32 %v2059_v6, %v2059_v6  ;;  %v2074_v12 = vsub.f32 %v2008_v18, %v94_v32  ;;  %v173_v36 = vld [vmem:[#allocation5 + $0x50] sm:$0xff]  ;;  %v174_v37 = vld [vmem:[#allocation5 + $0x58] sm:$0xff] }
  0xeb   :  { %v119_v50 = vmul.f32 %v2064_v8, %v2064_v8  ;;  %v2079_v14 = vsub.f32 %v2011_v20, %v94_v32  ;;  %v2084_v16 = vsub.f32 %v2014_v22, %v94_v32  ;;  %v2089_v18 = vsub.f32 %v2017_v24, %v94_v32 }
  0xec   :  { %v128_v41 = vadd.f32 %v127_v1, %v113_v0  ;;  %v120_v52 = vmul.f32 %v2069_v10, %v2069_v10  ;;  %v121_v54 = vmul.f32 %v2074_v12, %v2074_v12  ;;  %v2094_v20 = vsub.f32 %v2020_v26, %v94_v32 }
  0xed   :  { %v122_v56 = vmul.f32 %v2079_v14, %v2079_v14  ;;  %v123_v58 = vmul.f32 %v2084_v16, %v2084_v16  ;;  %v2099_v22 = vsub.f32 %v2023_v28, %v94_v32  ;;  %v124_v60 = vmul.f32 %v2089_v18, %v2089_v18  ;;  %v220_v28 = vld [vmem:[#allocation5 + $0x1c8] sm:$0xff]  ;;  %v222_v32 = vld [vmem:[#allocation5 + $0x1d8] sm:$0xff] }
  0xee   :  { %v129_v43 = vadd.f32 %v128_v41, %v114_v2  ;;  %v125_v24 = vmul.f32 %v2094_v20, %v2094_v20  ;;  %v1531_v17 = vpack.c.bf16 %v220_v28, %v219_v9  ;;  %v1535_v0 = vpack.c.bf16 %v222_v32, %v221_v30  ;;  %v205_v2 = vld [vmem:[#allocation5 + $0x150] sm:$0xff]  ;;  %v206_v41 = vld [vmem:[#allocation5 + $0x158] sm:$0xff]  ;;  %v275_v9 = vld [vmem:[#allocation5 + $0x380] sm:$0xff] }
  0xef   :  { %v126_v63 = vmul.f32 %v2099_v22, %v2099_v22  ;;  %v1505_v1 = vpack.c.bf16 %v174_v37, %v173_v36  ;;  %v276_v28 = vld [vmem:[#allocation5 + $0x388] sm:$0xff]  ;;  %v1549_v31 = vpack.c.bf16 %v228_v23, %v227_v21  ;;  %v246_v36 = vld [vmem:[#allocation5 + $0x298] sm:$0xff]  ;;  %v277_v37 = vld [vmem:[#allocation5 + $0x390] sm:$0xff] }
  0xf0   :  { %v130_v45 = vadd.f32 %v129_v43, %v115_v4  ;;  %1532 = vmatprep.subr.bf16.mxu1 %v1531_v17  ;;  %v191_v4 = vld [vmem:[#allocation5 + $0xe0] sm:$0xff]  ;;  %v1537_v43 = vpack.c.bf16 %v206_v41, %v205_v2  ;;  %v1579_v13 = vpack.c.bf16 %v276_v28, %v275_v9  ;;  %v236_v21 = vld [vmem:[#allocation5 + $0x248] sm:$0xff] }
  0xf1   :  { %1534 = vmatpush3.bf16.msra.mxu1 %v1533_v25  ;;  %1506 = vmatpush3.bf16.msra.mxu0 %v1505_v1  ;;  %v259_v25 = vld [vmem:[#allocation5 + $0x300] sm:$0xff] }
  0xf2   :  { %v131_v47 = vadd.f32 %v130_v45, %v116_v44  ;;  %v192_v44 = vld [vmem:[#allocation5 + $0xe8] sm:$0xff]  ;;  %v223_v45 = vld [vmem:[#allocation5 + $0x1e0] sm:$0xff]  ;;  %1536 = vmatprep.subr.bf16.mxu1 %v1535_v0  ;;  %v1581_v32 = vpack.c.bf16 %v260_v27, %v259_v25  ;;  %v278_v0 = vld [vmem:[#allocation5 + $0x398] sm:$0xff] }
  0xf3   :  { %v251_v9 = vld [vmem:[#allocation5 + $0x2c0] sm:$0xff] }
  0xf4   :  { %v132_v49 = vadd.f32 %v131_v47, %v117_v46  ;;  %v224_v46 = vld [vmem:[#allocation5 + $0x1e8] sm:$0xff]  ;;  %v1507_v47 = vpack.c.bf16 %v192_v44, %v191_v4  ;;  %v230_v44 = vld [vmem:[#allocation5 + $0x218] sm:$0xff]  ;;  %v283_v28 = vld [vmem:[#allocation5 + $0x3c0] sm:$0xff] }
  0xf5   :  { %1538 = vmatpush3.bf16.msra.mxu1 %v1537_v43  ;;  %v229_v43 = vld [vmem:[#allocation5 + $0x210] sm:$0xff]  ;;  %v267_v27 = vld [vmem:[#allocation5 + $0x340] sm:$0xff] }
  0xf6   :  { %v133_v51 = vadd.f32 %v132_v49, %v118_v48  ;;  %v1539_v48 = vpack.c.bf16 %v224_v46, %v223_v45  ;;  %v175_v49 = vld [vmem:[#allocation5 + $0x60] sm:$0xff]  ;;  %1508 = vmatprep.subr.bf16.mxu0 %v1507_v47  ;;  %v261_v45 = vld [vmem:[#allocation5 + $0x310] sm:$0xff]  ;;  %v262_v46 = vld [vmem:[#allocation5 + $0x318] sm:$0xff] }
  0xf7   :  { %v247_v47 = vld [vmem:[#allocation5 + $0x2a0] sm:$0xff] }
  0xf8   :  { %v134_v53 = vadd.f32 %v133_v51, %v119_v50  ;;  %v176_v50 = vld [vmem:[#allocation5 + $0x68] sm:$0xff]  ;;  %v207_v51 = vld [vmem:[#allocation5 + $0x160] sm:$0xff]  ;;  %1540 = vmatprep.subr.bf16.mxu1 %v1539_v48  ;;  %v1551_v48 = vpack.c.bf16 %v246_v36, %v245_v29  ;;  %v285_v36 = vld [vmem:[#allocation5 + $0x3d0] sm:$0xff] }
  0xf9   :  { %v268_v29 = vld [vmem:[#allocation5 + $0x348] sm:$0xff] }
  0xfa   :  { %v135_v55 = vadd.f32 %v134_v53, %v120_v52  ;;  %v1509_v52 = vpack.c.bf16 %v176_v50, %v175_v49  ;;  %v208_v53 = vld [vmem:[#allocation5 + $0x168] sm:$0xff]  ;;  %v1583_v49 = vpack.c.bf16 %v278_v0, %v277_v37  ;;  %v286_v37 = vld [vmem:[#allocation5 + $0x3d8] sm:$0xff] }
  0xfb   :  { %v248_v50 = vld [vmem:[#allocation5 + $0x2a8] sm:$0xff] }
  0xfc   :  { %v136_v57 = vadd.f32 %v135_v55, %v121_v54  ;;  %v193_v54 = vld [vmem:[#allocation5 + $0xf0] sm:$0xff]  ;;  %v194_v55 = vld [vmem:[#allocation5 + $0xf8] sm:$0xff]  ;;  %1510 = vmatpush3.bf16.msra.mxu0 %v1509_v52  ;;  %v1585_v52 = vpack.c.bf16 %v262_v46, %v261_v45  ;;  %v255_v46 = vld [vmem:[#allocation5 + $0x2e0] sm:$0xff] }
  0xfd   :  { %v270_v45 = vld [vmem:[#allocation5 + $0x358] sm:$0xff] }
  0xfe   :  { %v137_v59 = vadd.f32 %v136_v57, %v122_v56  ;;  %v1541_v56 = vpack.c.bf16 %v208_v53, %v207_v51  ;;  %v1511_v57 = vpack.c.bf16 %v194_v55, %v193_v54  ;;  %v280_v51 = vld [vmem:[#allocation5 + $0x3a8] sm:$0xff]  ;;  %v231_v53 = vld [vmem:[#allocation5 + $0x220] sm:$0xff]  ;;  %v1555_v55 = vpack.c.bf16 %v248_v50, %v247_v47 }
  0xff   :  { %v232_v54 = vld [vmem:[#allocation5 + $0x228] sm:$0xff] }
 0x100   :  { %v138_v61 = vadd.f32 %v137_v59, %v123_v58  ;;  %v225_v58 = vld [vmem:[#allocation5 + $0x1f0] sm:$0xff]  ;;  %v226_v59 = vld [vmem:[#allocation5 + $0x1f8] sm:$0xff]  ;;  %1542 = vmatpush3.bf16.msra.mxu1 %v1541_v56  ;;  %1512 = vmatprep.subr.bf16.mxu0 %v1511_v57  ;;  %v263_v57 = vld [vmem:[#allocation5 + $0x320] sm:$0xff] }
 0x101   :  { %v256_v47 = vld [vmem:[#allocation5 + $0x2e8] sm:$0xff] }
 0x102   :  { %v139_v62 = vadd.f32 %v138_v61, %v124_v60  ;;  %v177_v60 = vld [vmem:[#allocation5 + $0x70] sm:$0xff]  ;;  %v1543_v61 = vpack.c.bf16 %v226_v59, %v225_v58  ;;  %v264_v58 = vld [vmem:[#allocation5 + $0x328] sm:$0xff] }
 0x103   :  { %v249_v59 = vld [vmem:[#allocation5 + $0x2b0] sm:$0xff] }
 0x104   :  { %v140_v26 = vadd.f32 %v139_v62, %v125_v24  ;;  %v178_v24 = vld [vmem:[#allocation5 + $0x78] sm:$0xff]  ;;  %v209_v62 = vld [vmem:[#allocation5 + $0x170] sm:$0xff]  ;;  %1544 = vmatprep.subr.bf16.mxu1 %v1543_v61 }
 0x105   :  { %v282_v61 = vld [vmem:[#allocation5 + $0x3b8] sm:$0xff] }
 0x106   :  { %v141_v3 = vadd.f32 %v140_v26, %v126_v63  ;;  %v210_v63 = vld [vmem:[#allocation5 + $0x178] sm:$0xff]  ;;  %v1513_v26 = vpack.c.bf16 %v178_v24, %v177_v60  ;;  %v1589_v24 = vpack.c.bf16 %v264_v58, %v263_v57 }
 0x107   :  { %v250_v60 = vld [vmem:[#allocation5 + $0x2b8] sm:$0xff] }
 0x108   :  { %142 = vadd.xlane.f32.xlu0 %v141_v3  ;;  %v1545_v3 = vpack.c.bf16 %v210_v63, %v209_v62  ;;  %1514 = vmatpush3.bf16.msra.mxu0 %v1513_v26  ;;  %v233_v62 = vld [vmem:[#allocation5 + $0x230] sm:$0xff]  ;;  %v234_v63 = vld [vmem:[#allocation5 + $0x238] sm:$0xff]  ;;  %v1559_v26 = vpack.c.bf16 %v250_v60, %v249_v59 }
 0x109   :  { %1548 = vmatprep.subr.bf16.mxu0 %v1547_v11  ;;  %v252_v11 = vld [vmem:[#allocation5 + $0x2c8] sm:$0xff]  ;;  %v290_v57 = vld [vmem:[#allocation5 + $0x3f8] sm:$0xff]  ;;  %v241_v60 = vld [vmem:[#allocation5 + $0x270] sm:$0xff] }
 0x10a   :  { %1546 = vmatpush3.bf16.msra.mxu1 %v1545_v3  ;;  %v1563_v23 = vpack.c.bf16 %v252_v11, %v251_v9 }
 0x10b   :  { %1580 = vmatprep.subr.bf16.mxu1 %v1579_v13  ;;  %v284_v13 = vld [vmem:[#allocation5 + $0x3c8] sm:$0xff] }
 0x10c   :  { %v1595_v25 = vpack.c.bf16 %v284_v13, %v283_v28  ;;  %v291_v13 = vld [vmem:[#allocation5 + $0x400] sm:$0xff] }
 0x195   :  { %v143_v15 = vpop.xlane.xlu0 %142 }
 0x196   :  { %v144_v17 = vmul.f32 0.00048828125, %v143_v15  ;;  %v1561_v15 = vpack.c.bf16 %v234_v63, %v233_v62  ;;  %v274_v62 = vld [vmem:[#allocation5 + $0x378] sm:$0xff]  ;;  %v307_v63 = vld [vmem:[#allocation5 + $0x480] sm:$0xff] }
 0x198   :  { %v145_v19 = vadd.f32 1e-05, %v144_v17  ;;  %v1593_v17 = vpack.c.bf16 %v266_v7, %v265_v5  ;;  %v340_v5 = vld [vmem:[#allocation5 + $0x588] sm:$0xff] }
 0x19a   :  { %1773 = vrsqrt.f32 %v145_v19  ;;  %v235_v19 = vld [vmem:[#allocation5 + $0x240] sm:$0xff] }
 0x19b   :  { %v1565_v0 = vpack.c.bf16 %v236_v21, %v235_v19  ;;  %v324_v19 = vld [vmem:[#allocation5 + $0x508] sm:$0xff]  ;;  %v309_v21 = vld [vmem:[#allocation5 + $0x490] sm:$0xff] }
 0x1a4   :  { %v2107_v30 = vpop.eup %1773 }
 0x1a5   :  { %v148_v1 = vmul.f32 %v2107_v30, %v2031_v34  ;;  %v150_v2 = vmul.f32 %v2107_v30, %v2041_v38  ;;  %v147_v41 = vmul.f32 %v2107_v30, %v2028_v33  ;;  %v149_v4 = vmul.f32 %v2107_v30, %v2034_v35  ;;  %v279_v34 = vld [vmem:[#allocation5 + $0x3a0] sm:$0xff] }
 0x1a6   :  { %v152_v33 = vmul.f32 %v2107_v30, %v2049_v40  ;;  %v154_v35 = vmul.f32 %v2107_v30, %v2059_v6  ;;  %v1553_v38 = vpack.c.bf16 %v230_v44, %v229_v43  ;;  %v1587_v56 = vpack.c.bf16 %v280_v51, %v279_v34  ;;  %v281_v40 = vld [vmem:[#allocation5 + $0x3b0] sm:$0xff]  ;;  %v239_v51 = vld [vmem:[#allocation5 + $0x260] sm:$0xff] }
 0x1a7   :  { %490 = vmatprep.mubr.f32.mxu0 %v148_v1  ;;  %560 = vmatprep.mubr.f32.mxu1 %v150_v2  ;;  %v1557_v6 = vpack.c.bf16 %v232_v54, %v231_v53  ;;  %v1591_v3 = vpack.c.bf16 %v282_v61, %v281_v40  ;;  %v1597_v1 = vpack.c.bf16 %v268_v29, %v267_v27  ;;  %v237_v2 = vld [vmem:[#allocation5 + $0x250] sm:$0xff]  ;;  %v272_v53 = vld [vmem:[#allocation5 + $0x368] sm:$0xff]  ;;  %v242_v40 = vld [vmem:[#allocation5 + $0x278] sm:$0xff] }
 0x1a8   :  { %491 = vmatmul.mubr.f32.vlgmr.msra.gmra.mrb[0].mxu0 %v147_v41  ;;  %561 = vmatmul.mubr.f32.vlgmr.msra.gmra.mrb[0].mxu1 %v149_v4  ;;  %v238_v41 = vld [vmem:[#allocation5 + $0x258] sm:$0xff]  ;;  %v1599_v43 = vpack.c.bf16 %v286_v37, %v285_v36  ;;  %v269_v44 = vld [vmem:[#allocation5 + $0x350] sm:$0xff]  ;;  %v1577_v7 = vpack.c.bf16 %v242_v40, %v241_v60  ;;  %v315_v40 = vld [vmem:[#allocation5 + $0x4c0] sm:$0xff] }
 0x1a9   :  { %1550 = vmatpush3.bf16.msra.mxu0 %v1549_v31  ;;  %1582 = vmatpush3.bf16.msra.mxu1 %v1581_v32  ;;  %v253_v31 = vld [vmem:[#allocation5 + $0x2d0] sm:$0xff]  ;;  %v254_v32 = vld [vmem:[#allocation5 + $0x2d8] sm:$0xff]  ;;  %v1569_v50 = vpack.c.bf16 %v238_v41, %v237_v2  ;;  %v1601_v34 = vpack.c.bf16 %v270_v45, %v269_v44  ;;  %v156_v2 = vmul.f32 %v2107_v30, %v2069_v10  ;;  %v311_v44 = vld [vmem:[#allocation5 + $0x4a0] sm:$0xff] }
 0x1aa   :  { %630 = vmatprep.mubr.f32.mxu0 %v152_v33  ;;  %700 = vmatprep.mubr.f32.mxu1 %v154_v35  ;;  %v1567_v4 = vpack.c.bf16 %v254_v32, %v253_v31  ;;  %v240_v33 = vld [vmem:[#allocation5 + $0x268] sm:$0xff]  ;;  %v1571_v35 = vpack.c.bf16 %v256_v47, %v255_v46  ;;  %v257_v54 = vld [vmem:[#allocation5 + $0x2f0] sm:$0xff]  ;;  %v342_v27 = vld [vmem:[#allocation5 + $0x598] sm:$0xff]  ;;  %v151_v31 = vmul.f32 %v2107_v30, %v2044_v39 }
 0x1ab   :  { %1552 = vmatprep.subr.bf16.mxu0 %v1551_v48  ;;  %1584 = vmatprep.subr.bf16.mxu1 %v1583_v49  ;;  %v287_v48 = vld [vmem:[#allocation5 + $0x3e0] sm:$0xff]  ;;  %v288_v49 = vld [vmem:[#allocation5 + $0x3e8] sm:$0xff]  ;;  %v1573_v58 = vpack.c.bf16 %v240_v33, %v239_v51  ;;  %v153_v32 = vmul.f32 %v2107_v30, %v2054_v42  ;;  %v293_v37 = vld [vmem:[#allocation5 + $0x410] sm:$0xff]  ;;  %v158_v39 = vmul.f32 %v2107_v30, %v2079_v14 }
 0x1ac   :  { %v312_v45 = vld [vmem:[#allocation5 + $0x4a8] sm:$0xff]  ;;  %v343_v42 = vld [vmem:[#allocation5 + $0x5a0] sm:$0xff]  ;;  %v346_v14 = vld [vmem:[#allocation5 + $0x5b8] sm:$0xff] }
 0x1ad   :  { %1554 = vmatpush3.bf16.msra.mxu0 %v1553_v38  ;;  %1586 = vmatpush3.bf16.msra.mxu1 %v1585_v52  ;;  %v1603_v38 = vpack.c.bf16 %v288_v49, %v287_v48  ;;  %v271_v52 = vld [vmem:[#allocation5 + $0x360] sm:$0xff]  ;;  %v344_v46 = vld [vmem:[#allocation5 + $0x5a8] sm:$0xff]  ;;  %v1619_v49 = vpack.c.bf16 %v312_v45, %v311_v44  ;;  %v330_v60 = vld [vmem:[#allocation5 + $0x538] sm:$0xff] }
 0x1ae   :  { %1556 = vmatprep.subr.bf16.mxu0 %v1555_v55  ;;  %1588 = vmatprep.subr.bf16.mxu1 %v1587_v56  ;;  %v258_v55 = vld [vmem:[#allocation5 + $0x2f8] sm:$0xff]  ;;  %v289_v56 = vld [vmem:[#allocation5 + $0x3f0] sm:$0xff]  ;;  %v1605_v59 = vpack.c.bf16 %v272_v53, %v271_v52  ;;  %v295_v10 = vld [vmem:[#allocation5 + $0x420] sm:$0xff]  ;;  %v1651_v51 = vpack.c.bf16 %v344_v46, %v343_v42 }
 0x1af   :  { %v1575_v61 = vpack.c.bf16 %v258_v55, %v257_v54  ;;  %v328_v33 = vld [vmem:[#allocation5 + $0x528] sm:$0xff]  ;;  %v345_v52 = vld [vmem:[#allocation5 + $0x5b0] sm:$0xff]  ;;  %v335_v45 = vld [vmem:[#allocation5 + $0x560] sm:$0xff] }
 0x1b0   :  { %v304_v44 = vld [vmem:[#allocation5 + $0x468] sm:$0xff]  ;;  %v321_v46 = vld [vmem:[#allocation5 + $0x4f0] sm:$0xff] }
 0x1b1   :  { %1558 = vmatpush3.bf16.msra.mxu0 %v1557_v6  ;;  %1590 = vmatpush3.bf16.msra.mxu1 %v1589_v24  ;;  %v1607_v6 = vpack.c.bf16 %v290_v57, %v289_v56  ;;  %v273_v24 = vld [vmem:[#allocation5 + $0x370] sm:$0xff]  ;;  %v298_v57 = vld [vmem:[#allocation5 + $0x438] sm:$0xff]  ;;  %v336_v42 = vld [vmem:[#allocation5 + $0x568] sm:$0xff] }
 0x1b2   :  { %1560 = vmatprep.subr.bf16.mxu0 %v1559_v26  ;;  %1592 = vmatprep.subr.bf16.mxu1 %v1591_v3  ;;  %v308_v26 = vld [vmem:[#allocation5 + $0x488] sm:$0xff]  ;;  %v339_v3 = vld [vmem:[#allocation5 + $0x580] sm:$0xff]  ;;  %v1609_v9 = vpack.c.bf16 %v274_v62, %v273_v24  ;;  %v297_v56 = vld [vmem:[#allocation5 + $0x430] sm:$0xff] }
 0x1b3   :  { %v1611_v11 = vpack.c.bf16 %v308_v26, %v307_v63  ;;  %v1643_v28 = vpack.c.bf16 %v340_v5, %v339_v3  ;;  %v348_v24 = vld [vmem:[#allocation5 + $0x5c8] sm:$0xff]  ;;  %v1625_v62 = vpack.c.bf16 %v298_v57, %v297_v56  ;;  %v299_v3 = vld [vmem:[#allocation5 + $0x440] sm:$0xff] }
 0x1b4   :  { %v300_v5 = vld [vmem:[#allocation5 + $0x448] sm:$0xff] }
 0x1b5   :  { %1562 = vmatpush3.bf16.msra.mxu0 %v1561_v15  ;;  %1594 = vmatpush3.bf16.msra.mxu1 %v1593_v17  ;;  %v292_v15 = vld [vmem:[#allocation5 + $0x408] sm:$0xff]  ;;  %v323_v17 = vld [vmem:[#allocation5 + $0x500] sm:$0xff] }
 0x1b6   :  { %1564 = vmatprep.subr.bf16.mxu0 %v1563_v23  ;;  %1596 = vmatprep.subr.bf16.mxu1 %v1595_v25  ;;  %v310_v23 = vld [vmem:[#allocation5 + $0x498] sm:$0xff]  ;;  %v341_v25 = vld [vmem:[#allocation5 + $0x590] sm:$0xff]  ;;  %v1613_v29 = vpack.c.bf16 %v292_v15, %v291_v13  ;;  %v1645_v36 = vpack.c.bf16 %v324_v19, %v323_v17  ;;  %v1629_v19 = vpack.c.bf16 %v300_v5, %v299_v3 }
 0x1b7   :  { %v1615_v41 = vpack.c.bf16 %v310_v23, %v309_v21  ;;  %v318_v13 = vld [vmem:[#allocation5 + $0x4d8] sm:$0xff]  ;;  %v349_v15 = vld [vmem:[#allocation5 + $0x5d0] sm:$0xff]  ;;  %v155_v5 = vmul.f32 %v2107_v30, %v2064_v8  ;;  %v408_v8 = vld [vmem:[#allocation5 + $0x7a8] sm:$0xff] }
 0x1b8   :  { %v350_v17 = vld [vmem:[#allocation5 + $0x5d8] sm:$0xff] }
 0x1b9   :  { %1566 = vmatpush3.bf16.msra.mxu0 %v1565_v0  ;;  %1598 = vmatpush3.bf16.msra.mxu1 %v1597_v1  ;;  %v294_v0 = vld [vmem:[#allocation5 + $0x418] sm:$0xff]  ;;  %v325_v1 = vld [vmem:[#allocation5 + $0x510] sm:$0xff] }
 0x1ba   :  { %1568 = vmatprep.subr.bf16.mxu0 %v1567_v4  ;;  %1600 = vmatprep.subr.bf16.mxu1 %v1599_v43  ;;  %v1647_v4 = vpack.c.bf16 %v342_v27, %v341_v25  ;;  %v326_v43 = vld [vmem:[#allocation5 + $0x518] sm:$0xff]  ;;  %v1617_v47 = vpack.c.bf16 %v294_v0, %v293_v37  ;;  %v301_v25 = vld [vmem:[#allocation5 + $0x450] sm:$0xff]  ;;  %v320_v37 = vld [vmem:[#allocation5 + $0x4e8] sm:$0xff] }
 0x1bb   :  { %v1649_v48 = vpack.c.bf16 %v326_v43, %v325_v1  ;;  %v302_v27 = vld [vmem:[#allocation5 + $0x458] sm:$0xff]  ;;  %v351_v0 = vld [vmem:[#allocation5 + $0x5e0] sm:$0xff]  ;;  %v352_v1 = vld [vmem:[#allocation5 + $0x5e8] sm:$0xff] }
 0x1bc   :  { %v303_v43 = vld [vmem:[#allocation5 + $0x460] sm:$0xff]  ;;  %v406_v3 = vld [vmem:[#allocation5 + $0x798] sm:$0xff] }
 0x1bd   :  { %1570 = vmatpush3.bf16.msra.mxu0 %v1569_v50  ;;  %1602 = vmatpush3.bf16.msra.mxu1 %v1601_v34  ;;  %v296_v50 = vld [vmem:[#allocation5 + $0x428] sm:$0xff]  ;;  %v327_v34 = vld [vmem:[#allocation5 + $0x520] sm:$0xff] }
 0x1be   :  { %1572 = vmatprep.subr.bf16.mxu0 %v1571_v35  ;;  %1604 = vmatprep.subr.bf16.mxu1 %v1603_v38  ;;  %v313_v35 = vld [vmem:[#allocation5 + $0x4b0] sm:$0xff]  ;;  %v314_v38 = vld [vmem:[#allocation5 + $0x4b8] sm:$0xff]  ;;  %v1621_v53 = vpack.c.bf16 %v296_v50, %v295_v10  ;;  %v1653_v54 = vpack.c.bf16 %v328_v33, %v327_v34  ;;  %v1637_v10 = vpack.c.bf16 %v304_v44, %v303_v43 }
 0x1bf   :  { %v1623_v55 = vpack.c.bf16 %v314_v38, %v313_v35  ;;  %v1669_v50 = vpack.c.bf16 %v336_v42, %v335_v45  ;;  %v306_v33 = vld [vmem:[#allocation5 + $0x478] sm:$0xff]  ;;  %v337_v35 = vld [vmem:[#allocation5 + $0x570] sm:$0xff] }
 0x1c0   :  { %v410_v43 = vld [vmem:[#allocation5 + $0x7b8] sm:$0xff] }
 0x1c1   :  { %1574 = vmatpush3.bf16.msra.mxu0 %v1573_v58  ;;  %1606 = vmatpush3.bf16.msra.mxu1 %v1605_v59  ;;  %v329_v58 = vld [vmem:[#allocation5 + $0x530] sm:$0xff]  ;;  %v1655_v59 = vpack.c.bf16 %v346_v14, %v345_v52  ;;  %v338_v52 = vld [vmem:[#allocation5 + $0x578] sm:$0xff]  ;;  %v371_v14 = vld [vmem:[#allocation5 + $0x680] sm:$0xff] }
 0x1c2   :  { %1576 = vmatprep.subr.bf16.mxu0 %v1575_v61  ;;  %1608 = vmatprep.subr.bf16.mxu1 %v1607_v6  ;;  %v316_v61 = vld [vmem:[#allocation5 + $0x4c8] sm:$0xff]  ;;  %v347_v6 = vld [vmem:[#allocation5 + $0x5c0] sm:$0xff]  ;;  %v1657_v63 = vpack.c.bf16 %v330_v60, %v329_v58  ;;  %v1673_v57 = vpack.c.bf16 %v338_v52, %v337_v35  ;;  %v362_v42 = vld [vmem:[#allocation5 + $0x638] sm:$0xff] }
 0x1c3   :  { %v1627_v26 = vpack.c.bf16 %v316_v61, %v315_v40  ;;  %v356_v60 = vld [vmem:[#allocation5 + $0x608] sm:$0xff]  ;;  %v387_v61 = vld [vmem:[#allocation5 + $0x700] sm:$0xff] }
 0x1c4   :  { %v364_v52 = vld [vmem:[#allocation5 + $0x648] sm:$0xff] }
 0x1c5   :  { %1578 = vmatpush3.bf16.msra.mxu0 %v1577_v7  ;;  %1610 = vmatpush3.bf16.msra.mxu1 %v1609_v9  ;;  %v331_v7 = vld [vmem:[#allocation5 + $0x540] sm:$0xff]  ;;  %v1659_v9 = vpack.c.bf16 %v348_v24, %v347_v6  ;;  %v388_v6 = vld [vmem:[#allocation5 + $0x708] sm:$0xff]  ;;  %v373_v24 = vld [vmem:[#allocation5 + $0x690] sm:$0xff] }
 0x1c6   :  { %1612 = vmatprep.subr.bf16.mxu0 %v1611_v11  ;;  %1644 = vmatprep.subr.bf16.mxu1 %v1643_v28  ;;  %v332_v11 = vld [vmem:[#allocation5 + $0x548] sm:$0xff]  ;;  %v317_v28 = vld [vmem:[#allocation5 + $0x4d0] sm:$0xff] }
 0x1c7   :  { %v1661_v21 = vpack.c.bf16 %v332_v11, %v331_v7  ;;  %v1631_v23 = vpack.c.bf16 %v318_v13, %v317_v28  ;;  %v1709_v7 = vpack.c.bf16 %v388_v6, %v387_v61  ;;  %v358_v11 = vld [vmem:[#allocation5 + $0x618] sm:$0xff]  ;;  %v389_v28 = vld [vmem:[#allocation5 + $0x710] sm:$0xff]  ;;  %v157_v13 = vmul.f32 %v2107_v30, %v2074_v12 }
 0x1c8   :  { %631 = vmatmul.mubr.f32.vlgmr.msra.gmra.mrb[2].mxu0 %v151_v31  ;;  %701 = vmatmul.mubr.f32.vlgmr.msra.gmra.mrb[2].mxu1 %v153_v32  ;;  %v1663_v31 = vpack.c.bf16 %v350_v17, %v349_v15  ;;  %v334_v32 = vld [vmem:[#allocation5 + $0x558] sm:$0xff]  ;;  %v365_v61 = vld [vmem:[#allocation5 + $0x650] sm:$0xff] }
 0x1c9   :  { %1614 = vmatpush3.bf16.msra.mxu0 %v1613_v29  ;;  %770 = vmatprep.mubr.f32.mxu0 %v156_v2  ;;  %v333_v29 = vld [vmem:[#allocation5 + $0x550] sm:$0xff]  ;;  %v1633_v2 = vpack.c.bf16 %v302_v27, %v301_v25  ;;  %v390_v17 = vld [vmem:[#allocation5 + $0x718] sm:$0xff]  ;;  %v407_v27 = vld [vmem:[#allocation5 + $0x7a0] sm:$0xff] }
 0x1ca   :  { %1646 = vmatpush3.bf16.msra.mxu1 %v1645_v36  ;;  %840 = vmatprep.mubr.f32.mxu1 %v158_v39  ;;  %v319_v36 = vld [vmem:[#allocation5 + $0x4e0] sm:$0xff]  ;;  %v1667_v39 = vpack.c.bf16 %v352_v1, %v351_v0  ;;  %v1713_v12 = vpack.c.bf16 %v390_v17, %v389_v28  ;;  %v1715_v1 = vpack.c.bf16 %v408_v8, %v407_v27  ;;  %v366_v6 = vld [vmem:[#allocation5 + $0x658] sm:$0xff]  ;;  %v417_v27 = vld [vmem:[#allocation5 + $0x7f0] sm:$0xff] }
 0x1cb   :  { %1616 = vmatprep.subr.bf16.mxu0 %v1615_v41  ;;  %1648 = vmatprep.subr.bf16.mxu1 %v1647_v4  ;;  %v1665_v41 = vpack.c.bf16 %v334_v32, %v333_v29  ;;  %v1635_v4 = vpack.c.bf16 %v320_v37, %v319_v36  ;;  %v162_v29 = vmul.f32 %v2107_v30, %v2099_v22  ;;  %v359_v36 = vld [vmem:[#allocation5 + $0x620] sm:$0xff]  ;;  %v360_v37 = vld [vmem:[#allocation5 + $0x628] sm:$0xff]  ;;  %v418_v8 = vld [vmem:[#allocation5 + $0x7f8] sm:$0xff] }
 0x1cc   :  { %v391_v0 = vld [vmem:[#allocation5 + $0x720] sm:$0xff]  ;;  %v1685_v44 = vpack.c.bf16 %v360_v37, %v359_v36  ;;  %v370_v36 = vld [vmem:[#allocation5 + $0x678] sm:$0xff]  ;;  %v1735_v37 = vpack.c.bf16 %v418_v8, %v417_v27 }
 0x1cd   :  { %1618 = vmatpush3.bf16.msra.mxu0 %v1617_v47  ;;  %v322_v47 = vld [vmem:[#allocation5 + $0x4f8] sm:$0xff]  ;;  %v399_v17 = vld [vmem:[#allocation5 + $0x760] sm:$0xff] }
 0x1ce   :  { %1650 = vmatpush3.bf16.msra.mxu1 %v1649_v48  ;;  %1620 = vmatprep.subr.bf16.mxu0 %v1619_v49  ;;  %v353_v48 = vld [vmem:[#allocation5 + $0x5f0] sm:$0xff]  ;;  %v354_v49 = vld [vmem:[#allocation5 + $0x5f8] sm:$0xff]  ;;  %v1639_v34 = vpack.c.bf16 %v322_v47, %v321_v46 }
 0x1cf   :  { %1652 = vmatprep.subr.bf16.mxu1 %v1651_v51  ;;  %v305_v51 = vld [vmem:[#allocation5 + $0x470] sm:$0xff]  ;;  %v1671_v38 = vpack.c.bf16 %v354_v49, %v353_v48  ;;  %v394_v48 = vld [vmem:[#allocation5 + $0x738] sm:$0xff]  ;;  %v379_v49 = vld [vmem:[#allocation5 + $0x6c0] sm:$0xff] }
 0x1d0   :  { %v1641_v56 = vpack.c.bf16 %v306_v33, %v305_v51  ;;  %v393_v46 = vld [vmem:[#allocation5 + $0x730] sm:$0xff] }
 0x1d1   :  { %1622 = vmatpush3.bf16.msra.mxu0 %v1621_v53  ;;  %v372_v53 = vld [vmem:[#allocation5 + $0x688] sm:$0xff]  ;;  %v1721_v33 = vpack.c.bf16 %v394_v48, %v393_v46 }
 0x1d2   :  { %1654 = vmatpush3.bf16.msra.mxu1 %v1653_v54  ;;  %1624 = vmatprep.subr.bf16.mxu0 %v1623_v55  ;;  %v403_v54 = vld [vmem:[#allocation5 + $0x780] sm:$0xff]  ;;  %v404_v55 = vld [vmem:[#allocation5 + $0x788] sm:$0xff]  ;;  %v1675_v58 = vpack.c.bf16 %v372_v53, %v371_v14 }
 0x1d3   :  { %1656 = vmatprep.subr.bf16.mxu1 %v1655_v59  ;;  %v355_v59 = vld [vmem:[#allocation5 + $0x600] sm:$0xff]  ;;  %v1707_v40 = vpack.c.bf16 %v404_v55, %v403_v54  ;;  %v396_v54 = vld [vmem:[#allocation5 + $0x748] sm:$0xff]  ;;  %v381_v55 = vld [vmem:[#allocation5 + $0x6d0] sm:$0xff] }
 0x1d4   :  { %v395_v14 = vld [vmem:[#allocation5 + $0x740] sm:$0xff] }
 0x1d5   :  { %1626 = vmatpush3.bf16.msra.mxu0 %v1625_v62  ;;  %v374_v62 = vld [vmem:[#allocation5 + $0x698] sm:$0xff] }
 0x1d6   :  { %1658 = vmatpush3.bf16.msra.mxu1 %v1657_v63  ;;  %1628 = vmatprep.subr.bf16.mxu0 %v1627_v26  ;;  %v1677_v63 = vpack.c.bf16 %v356_v60, %v355_v59  ;;  %v405_v26 = vld [vmem:[#allocation5 + $0x790] sm:$0xff]  ;;  %v1679_v15 = vpack.c.bf16 %v374_v62, %v373_v24  ;;  %v1725_v60 = vpack.c.bf16 %v396_v54, %v395_v14 }
 0x1d7   :  { %1660 = vmatprep.subr.bf16.mxu1 %v1659_v9  ;;  %v357_v9 = vld [vmem:[#allocation5 + $0x610] sm:$0xff]  ;;  %v1711_v25 = vpack.c.bf16 %v406_v3, %v405_v26  ;;  %v383_v26 = vld [vmem:[#allocation5 + $0x6e0] sm:$0xff]  ;;  %v384_v3 = vld [vmem:[#allocation5 + $0x6e8] sm:$0xff] }
 0x1d8   :  { %v397_v24 = vld [vmem:[#allocation5 + $0x750] sm:$0xff]  ;;  %v1699_v28 = vpack.c.bf16 %v384_v3, %v383_v26 }
 0x1d9   :  { %1630 = vmatpush3.bf16.msra.mxu0 %v1629_v19  ;;  %v375_v19 = vld [vmem:[#allocation5 + $0x6a0] sm:$0xff] }
 0x1da   :  { %1662 = vmatpush3.bf16.msra.mxu1 %v1661_v21  ;;  %1632 = vmatprep.subr.bf16.mxu0 %v1631_v23  ;;  %v376_v21 = vld [vmem:[#allocation5 + $0x6a8] sm:$0xff]  ;;  %v160_v23 = vmul.f32 %v2107_v30, %v2089_v18 }
 0x1db   :  { %1664 = vmatprep.subr.bf16.mxu1 %v1663_v31  ;;  %v1681_v31 = vpack.c.bf16 %v358_v11, %v357_v9  ;;  %v1683_v32 = vpack.c.bf16 %v376_v21, %v375_v19  ;;  %v392_v18 = vld [vmem:[#allocation5 + $0x728] sm:$0xff]  ;;  %v1697_v9 = vpack.c.bf16 %v366_v6, %v365_v61 }
 0x1dc   :  { %v1717_v22 = vpack.c.bf16 %v392_v18, %v391_v0  ;;  %v400_v21 = vld [vmem:[#allocation5 + $0x768] sm:$0xff]  ;;  %v401_v0 = vld [vmem:[#allocation5 + $0x770] sm:$0xff] }
 0x1dd   :  { %1634 = vmatpush3.bf16.msra.mxu0 %v1633_v2  ;;  %v377_v2 = vld [vmem:[#allocation5 + $0x6b0] sm:$0xff] }
 0x1de   :  { %1666 = vmatpush3.bf16.msra.mxu1 %v1665_v41  ;;  %1636 = vmatprep.subr.bf16.mxu0 %v1635_v4  ;;  %v378_v41 = vld [vmem:[#allocation5 + $0x6b8] sm:$0xff]  ;;  %v409_v4 = vld [vmem:[#allocation5 + $0x7b0] sm:$0xff] }
 0x1df   :  { %1668 = vmatprep.subr.bf16.mxu1 %v1667_v39  ;;  %v1687_v45 = vpack.c.bf16 %v378_v41, %v377_v2  ;;  %v361_v39 = vld [vmem:[#allocation5 + $0x630] sm:$0xff]  ;;  %v1719_v47 = vpack.c.bf16 %v410_v43, %v409_v4  ;;  %v159_v41 = vmul.f32 %v2107_v30, %v2084_v16  ;;  %v161_v4 = vmul.f32 %v2107_v30, %v2094_v20  ;;  %v993_v43 = vld [vmem:[#allocation7] sm:$0xff]  ;;  %v998_v30 = vld [vmem:[#allocation7 + $0x28] sm:$0xff] }
 0x1e0   :  { %v1689_v51 = vpack.c.bf16 %v362_v42, %v361_v39  ;;  %v1009_v39 = vmul.f32 %v993_v43, %v993_v43  ;;  %v997_v20 = vld [vmem:[#allocation7 + $0x20] sm:$0xff] }
 0x1e1   :  { %1638 = vmatpush3.bf16.msra.mxu0 %v1637_v10  ;;  %v380_v10 = vld [vmem:[#allocation5 + $0x6c8] sm:$0xff] }
 0x1e2   :  { %1670 = vmatpush3.bf16.msra.mxu1 %v1669_v50  ;;  %1640 = vmatprep.subr.bf16.mxu0 %v1639_v34  ;;  %v411_v50 = vld [vmem:[#allocation5 + $0x7c0] sm:$0xff]  ;;  %v412_v34 = vld [vmem:[#allocation5 + $0x7c8] sm:$0xff]  ;;  %v1691_v35 = vpack.c.bf16 %v380_v10, %v379_v49 }
 0x1e3   :  { %1672 = vmatprep.subr.bf16.mxu1 %v1671_v38  ;;  %v363_v38 = vld [vmem:[#allocation5 + $0x640] sm:$0xff]  ;;  %v1723_v53 = vpack.c.bf16 %v412_v34, %v411_v50  ;;  %v1013_v34 = vmul.f32 %v997_v20, %v997_v20 }
 0x1e4   :  { %v1693_v59 = vpack.c.bf16 %v364_v52, %v363_v38  ;;  %v999_v38 = vld [vmem:[#allocation7 + $0x30] sm:$0xff]  ;;  %v1000_v52 = vld [vmem:[#allocation7 + $0x38] sm:$0xff] }
 0x1e5   :  { %1642 = vmatpush3.bf16.msra.mxu0 %v1641_v56  ;;  %v382_v56 = vld [vmem:[#allocation5 + $0x6d8] sm:$0xff] }
 0x1e6   :  { %1674 = vmatpush3.bf16.msra.mxu1 %v1673_v57  ;;  %1676 = vmatprep.subr.bf16.mxu0 %v1675_v58  ;;  %v413_v57 = vld [vmem:[#allocation5 + $0x7d0] sm:$0xff]  ;;  %v414_v58 = vld [vmem:[#allocation5 + $0x7d8] sm:$0xff] }
 0x1e7   :  { %1708 = vmatprep.subr.bf16.mxu1 %v1707_v40  ;;  %v1695_v40 = vpack.c.bf16 %v382_v56, %v381_v55  ;;  %v1727_v62 = vpack.c.bf16 %v414_v58, %v413_v57  ;;  %v1016_v55 = vmul.f32 %v1000_v52, %v1000_v52  ;;  %v1749_v56 = vpack.c.bf16 %v1000_v52, %v999_v38 }
 0x1e8   :  { %771 = vmatmul.mubr.f32.vlgmr.msra.gmra.mrb[4].mxu0 %v155_v5  ;;  %v415_v5 = vld [vmem:[#allocation5 + $0x7e0] sm:$0xff] }
 0x1e9   :  { %841 = vmatmul.mubr.f32.vlgmr.msra.gmra.mrb[4].mxu1 %v157_v13  ;;  %1678 = vmatpush3.bf16.msra.mxu0 %v1677_v63  ;;  %v398_v63 = vld [vmem:[#allocation5 + $0x758] sm:$0xff]  ;;  %v367_v13 = vld [vmem:[#allocation5 + $0x660] sm:$0xff] }
 0x1ea   :  { %910 = vmatprep.mubr.f32.mxu0 %v160_v23  ;;  %1710 = vmatpush3.bf16.msra.mxu1 %v1709_v7  ;;  %v416_v7 = vld [vmem:[#allocation5 + $0x7e8] sm:$0xff]  ;;  %v1729_v11 = vpack.c.bf16 %v398_v63, %v397_v24  ;;  %v385_v23 = vld [vmem:[#allocation5 + $0x6f0] sm:$0xff] }
 0x1eb   :  { %980 = vmatprep.mubr.f32.mxu1 %v162_v29  ;;  %1680 = vmatprep.subr.bf16.mxu0 %v1679_v15  ;;  %v368_v15 = vld [vmem:[#allocation5 + $0x668] sm:$0xff]  ;;  %v1731_v19 = vpack.c.bf16 %v416_v7, %v415_v5 }
 0x1ec   :  { %1712 = vmatprep.subr.bf16.mxu1 %v1711_v25  ;;  %v386_v25 = vld [vmem:[#allocation5 + $0x6f8] sm:$0xff]  ;;  %v1701_v29 = vpack.c.bf16 %v368_v15, %v367_v13 }
 0x1ed   :  { %1682 = vmatpush3.bf16.msra.mxu0 %v1681_v31  ;;  %v1733_v31 = vpack.c.bf16 %v400_v21, %v399_v17 }
 0x1ee   :  { %1714 = vmatpush3.bf16.msra.mxu1 %v1713_v12  ;;  %1684 = vmatprep.subr.bf16.mxu0 %v1683_v32  ;;  %v1703_v12 = vpack.c.bf16 %v386_v25, %v385_v23  ;;  %v369_v32 = vld [vmem:[#allocation5 + $0x670] sm:$0xff] }
 0x1ef   :  { %1716 = vmatprep.subr.bf16.mxu1 %v1715_v1  ;;  %v402_v1 = vld [vmem:[#allocation5 + $0x778] sm:$0xff]  ;;  %v1705_v18 = vpack.c.bf16 %v370_v36, %v369_v32 }
 0x1f0   :  { %v1737_v2 = vpack.c.bf16 %v402_v1, %v401_v0 }
 0x1f1   :  { %1686 = vmatpush3.bf16.msra.mxu0 %v1685_v44  ;;  %v994_v44 = vld [vmem:[#allocation7 + $0x8] sm:$0xff] }
 0x1f2   :  { %1718 = vmatpush3.bf16.msra.mxu1 %v1717_v22  ;;  %1688 = vmatprep.subr.bf16.mxu0 %v1687_v45  ;;  %v995_v22 = vld [vmem:[#allocation7 + $0x10] sm:$0xff]  ;;  %v1902_v45 = vmov 0.0|0.0   ;;  %v1010_v42 = vmul.f32 %v994_v44, %v994_v44  ;;  %v1740_v46 = vpack.c.bf16 %v994_v44, %v993_v43 }
 0x1f3   :  { %1720 = vmatprep.subr.bf16.mxu1 %v1719_v47  ;;  %v996_v47 = vld [vmem:[#allocation7 + $0x18] sm:$0xff]  ;;  %v1011_v48 = vmul.f32 %v995_v22, %v995_v22 }
 0x1f4   :  { %v1025_v49 = vadd.f32 %v1010_v42, %v1009_v39  ;;  %v1012_v10 = vmul.f32 %v996_v47, %v996_v47  ;;  %v1743_v16 = vpack.c.bf16 %v996_v47, %v995_v22  ;;  %v1003_v39 = vld [vmem:[#allocation7 + $0x50] sm:$0xff]  ;;  %v1004_v42 = vld [vmem:[#allocation7 + $0x58] sm:$0xff] }
 0x1f5   :  { %1690 = vmatpush3.bf16.msra.mxu0 %v1689_v51 }
 0x1f6   :  { %1722 = vmatpush3.bf16.msra.mxu1 %v1721_v33  ;;  %1692 = vmatprep.subr.bf16.mxu0 %v1691_v35  ;;  %v1026_v50 = vadd.f32 %v1025_v49, %v1011_v48  ;;  %v1014_v33 = vmul.f32 %v998_v30, %v998_v30  ;;  %v1746_v35 = vpack.c.bf16 %v998_v30, %v997_v20  ;;  %v1005_v49 = vld [vmem:[#allocation7 + $0x60] sm:$0xff] }
 0x1f7   :  { %1724 = vmatprep.subr.bf16.mxu1 %v1723_v53  ;;  %v1015_v53 = vmul.f32 %v999_v38, %v999_v38  ;;  %v1019_v48 = vmul.f32 %v1003_v39, %v1003_v39  ;;  %v1020_v30 = vmul.f32 %v1004_v42, %v1004_v42 }
 0x1f8   :  { %v1027_v51 = vadd.f32 %v1026_v50, %v1012_v10  ;;  %v1006_v10 = vld [vmem:[#allocation7 + $0x68] sm:$0xff] }
 0x1f9   :  { %1694 = vmatpush3.bf16.msra.mxu0 %v1693_v59  ;;  %v1758_v50 = vpack.c.bf16 %v1006_v10, %v1005_v49  ;;  %v1022_v52 = vmul.f32 %v1006_v10, %v1006_v10 }
 0x1fa   :  { %1726 = vmatpush3.bf16.msra.mxu1 %v1725_v60  ;;  %1696 = vmatprep.subr.bf16.mxu0 %v1695_v40  ;;  %v1028_v14 = vadd.f32 %v1027_v51, %v1013_v34  ;;  %v1150_v40 = vld [vmem:[%s2178_s2] ss:$0 sm:$0xff]  ;;  %v1021_v51 = vmul.f32 %v1005_v49, %v1005_v49  ;;  %s1905_s2 = smov [#allocation8]  }
 0x1fb   :  { %1728 = vmatprep.subr.bf16.mxu1 %v1727_v62  ;;  %s1126_s29 = sshll.u32 %s1905_s2, 4  ;;  %s1127_s29 = int_to_ptr.vmem [resolvable:$true] %s1126_s29 }
 0x1fc   :  { %v1029_v54 = vadd.f32 %v1028_v14, %v1014_v33  ;;  %v1007_v33 = vld [vmem:[#allocation7 + $0x70] sm:$0xff]  ;;  %s1845_s6 = scalar_lea.vmem %s1127_s29, 128  ;;  %p1850_p11 = scmp.lt.s32.totalorder %s1127_s29, %s1127_s29 }
 0x1fd   :  { %1698 = vmatpush3.bf16.msra.mxu0 %v1697_v9  ;;  %p1846_p10 = scmp.ne.s32.totalorder %s1127_s29, %s1845_s6  ;;  %p1851_p12 = scmp.lt.s32.totalorder %s1845_s6, %s1845_s6 }
 0x1fe   :  { %1730 = vmatpush3.bf16.msra.mxu1 %v1729_v11  ;;  %1700 = vmatprep.subr.bf16.mxu0 %v1699_v28  ;;  %v1030_v57 = vadd.f32 %v1029_v54, %v1015_v53  ;;  %v1023_v54 = vmul.f32 %v1007_v33, %v1007_v33 }
 0x1ff   :  { %1732 = vmatprep.subr.bf16.mxu1 %v1731_v19  ;;  %p1852_p13 = por %p1851_p12, %p1850_p11 }
 0x200   :  { %v1031_v58 = vadd.f32 %v1030_v57, %v1016_v55 }
 0x201   :  { %1702 = vmatpush3.bf16.msra.mxu0 %v1701_v29  ;;  %p1853_p0 = pnand %p1852_p13, %p1846_p10 }
 0x202   :  { %1734 = vmatpush3.bf16.msra.mxu1 %v1733_v31  ;;  %1704 = vmatprep.subr.bf16.mxu0 %v1703_v12 }
 0x203   :  { %1736 = vmatprep.subr.bf16.mxu1 %v1735_v37 }
 0x205   :  { %1706 = vmatpush3.bf16.msra.mxu0 %v1705_v18 }
 0x206   :  { %1738 = vmatpush3.bf16.msra.mxu1 %v1737_v2  ;;  %1739 = vmatprep.subr.bf16.mxu0 %v1902_v45 }
 0x208   :  { %911 = vmatmul.mubr.f32.vlgmr.msra.gmra.mrb[6].mxu0 %v159_v41  ;;  %v1001_v41 = vld [vmem:[#allocation7 + $0x40] sm:$0xff] }
 0x209   :  { %981 = vmatmul.mubr.f32.vlgmr.msra.gmra.mrb[6].mxu1 %v161_v4  ;;  %1741 = vmatpush3.bf16.msra.mxu0 %v1740_v46  ;;  %v1002_v4 = vld [vmem:[#allocation7 + $0x48] sm:$0xff]  ;;  %v1017_v44 = vmul.f32 %v1001_v41, %v1001_v41  ;;  %v1755_v46 = vpack.c.bf16 %v1004_v42, %v1003_v39 }
 0x20a   :  { %1742 = vmatprep.subr.bf16.mxu0 %v1902_v45  ;;  %v1752_v43 = vpack.c.bf16 %v1002_v4, %v1001_v41  ;;  %v1018_v22 = vmul.f32 %v1002_v4, %v1002_v4 }
 0x20b   :  { %v1032_v47 = vadd.f32 %v1031_v58, %v1017_v44 }
 0x20d   :  { %1744 = vmatpush3.bf16.msra.mxu0 %v1743_v16  ;;  %v1904_v16 = vmov 0.0   ;;  %v1033_v20 = vadd.f32 %v1032_v47, %v1018_v22 }
 0x20e   :  { %1745 = vmatprep.subr.bf16.mxu0 %v1902_v45  ;;  %1480 = vmatprep.mubr.msk.f32.mxu0 %vm1903_vm0, %v1904_v16 }
 0x20f   :  { %v1034_v34 = vadd.f32 %v1033_v20, %v1019_v48 }
 0x211   :  { %1747 = vmatpush3.bf16.msra.mxu0 %v1746_v35  ;;  %v1008_v35 = vld [vmem:[#allocation7 + $0x78] sm:$0xff]  ;;  %v1035_v38 = vadd.f32 %v1034_v34, %v1020_v30 }
 0x212   :  { %1748 = vmatprep.subr.bf16.mxu0 %v1902_v45  ;;  %v1761_v14 = vpack.c.bf16 %v1008_v35, %v1007_v33 }
 0x213   :  { %v1036_v53 = vadd.f32 %v1035_v38, %v1021_v51 }
 0x215   :  { %1750 = vmatpush3.bf16.msra.mxu0 %v1749_v56  ;;  %v1037_v55 = vadd.f32 %v1036_v53, %v1022_v52  ;;  %v1024_v56 = vmul.f32 %v1008_v35, %v1008_v35 }
 0x216   :  { %1751 = vmatprep.subr.bf16.mxu0 %v1902_v45 }
 0x217   :  { %v1038_v57 = vadd.f32 %v1037_v55, %v1023_v54 }
 0x219   :  { %1753 = vmatpush3.bf16.msra.mxu0 %v1752_v43  ;;  %v1039_v58 = vadd.f32 %v1038_v57, %v1024_v56 }
 0x21a   :  { %1754 = vmatprep.subr.bf16.mxu0 %v1902_v45 }
 0x21d   :  { %1756 = vmatpush3.bf16.msra.mxu0 %v1755_v46 }
 0x21e   :  { %1757 = vmatprep.subr.bf16.mxu0 %v1902_v45 }
 0x221   :  { %1759 = vmatpush3.bf16.msra.mxu0 %v1758_v50 }
 0x222   :  { %1760 = vmatprep.subr.bf16.mxu0 %v1902_v45 }
 0x225   :  { %1762 = vmatpush3.bf16.msra.mxu0 %v1761_v14 }
 0x27b   :  { %v1183_v59 = vpop.f32.mrb[0].mxu0  ;;  %v1218_v60 = vpop.f32.mrb[0].mxu1 }
 0x27c   :  { %v1184_v61 = vpop.f32.mrb[1].mxu0  ;;  %v1219_v6 = vpop.f32.mrb[1].mxu1 }
 0x27d   :  { %v1185_v24 = vadd.f32 %v1184_v61, %v1183_v59  ;;  %v1220_v62 = vadd.f32 %v1219_v6, %v1218_v60 }
 0x27f   :  { %v493_v63 = vadd.f32 %v1185_v24, %v1150_v40 }
 0x281   :  { %v563_v26 = vadd.f32 %v1220_v62, %v493_v63 }
 0x29b   :  { %v1253_v3 = vpop.f32.mrb[2].mxu0  ;;  %v1288_v5 = vpop.f32.mrb[2].mxu1 }
 0x29c   :  { %v1254_v7 = vpop.f32.mrb[3].mxu0  ;;  %v1289_v9 = vpop.f32.mrb[3].mxu1 }
 0x29d   :  { %v1255_v11 = vadd.f32 %v1254_v7, %v1253_v3  ;;  %v1290_v28 = vadd.f32 %v1289_v9, %v1288_v5 }
 0x29f   :  { %v633_v13 = vadd.f32 %v1255_v11, %v563_v26 }
 0x2a1   :  { %v703_v15 = vadd.f32 %v1290_v28, %v633_v13 }
 0x2bb   :  { %v1323_v17 = vpop.f32.mrb[4].mxu0 }
 0x2bc   :  { %v1358_v19 = vpop.f32.mrb[4].mxu1  ;;  %v1324_v21 = vpop.f32.mrb[5].mxu0 }
 0x2bd   :  { %v1325_v23 = vadd.f32 %v1324_v21, %v1323_v17  ;;  %v1359_v25 = vpop.f32.mrb[5].mxu1 }
 0x2be   :  { %v1360_v27 = vadd.f32 %v1359_v25, %v1358_v19 }
 0x2bf   :  { %v773_v8 = vadd.f32 %v1325_v23, %v703_v15 }
 0x2c1   :  { %v843_v29 = vadd.f32 %v1360_v27, %v773_v8 }
 0x2db   :  { %v1393_v31 = vpop.f32.mrb[6].mxu0 }
 0x2dc   :  { %v1428_v12 = vpop.f32.mrb[6].mxu1  ;;  %v1394_v32 = vpop.f32.mrb[7].mxu0 }
 0x2dd   :  { %v1395_v36 = vadd.f32 %v1394_v32, %v1393_v31  ;;  %v1429_v37 = vpop.f32.mrb[7].mxu1 }
 0x2de   :  { %v1430_v0 = vadd.f32 %v1429_v37, %v1428_v12 }
 0x2df   :  { %v913_v1 = vadd.f32 %v1395_v36, %v843_v29 }
 0x2e1   :  { %v983_v18 = vadd.f32 %v1430_v0, %v913_v1 }
 0x2e3   :  { %v986_v2 = vmul.f32 %v983_v18, %v983_v18 }
 0x2e5   :  { %987 = vadd.xlane.f32.xlu1 %v986_v2 }
 0x372   :  { %v988_v59 = vpop.xlane.xlu1 %987 }
 0x373   :  { %v989_v60 = vmax.f32 %v988_v59, 1e-24 }
 0x375   :  { %1775 = vrsqrt.f32 %v989_v60 }
 0x37f   :  { %v1776_v40 = vpop.eup %1775 }
 0x380   :  { %v991_v61 = vmul.f32 %v1776_v40, %v983_v18 }
 0x382   :  { %1481 = vmatmul.mubr.f32.vlgmr.msra.gmra.mrb[8].mxu0 %v991_v61  ;;  %992 = vst [vmem:[#allocation8] sm:$0xff] %v991_v61 }
 0x383   :  { %1856 = shalt.err (!%p1853_p0)
}
 0x384   :  { %s1857_s9 = scalar_lea.hbm %s2180_s4, 128 }
 0x385   :  { %p1858_p1 = scmp.ne.s32.totalorder %s2180_s4, %s1857_s9  ;;  %p1861_p2 = scmp.lt.u32.totalorder %s1857_s9, %s2180_s4 }
 0x387   :  { %p1863_p3 = pnand %p1861_p2, %p1858_p1 }
 0x389   :  { %1866 = shalt.err (!%p1863_p3)
}
 0x38a   :  { %1129 = dma.vmem_to_hbm [thread:$0]  %s1127_s29, 128, %s2180_s4, [#allocation4]   ;;  %v1040_v45 = vrot.slane %v1039_v58, 4 }
 0x38b   :  { %s1906_s16 = smov [#allocation9]  }
 0x38c   :  { %v1041_v6 = vadd.f32 %v1040_v45, %v1039_v58  ;;  %s1136_s17 = sshll.u32 %s1906_s16, 4  ;;  %s1137_s17 = int_to_ptr.vmem [resolvable:$true] %s1136_s17 }
 0x38d   :  { %s1867_s1 = scalar_lea.vmem %s1137_s17, 128  ;;  %p1872_p5 = scmp.lt.s32.totalorder %s1137_s17, %s1137_s17 }
 0x38e   :  { %v1042_v24 = vrot.slane %v1041_v6, 2  ;;  %p1868_p4 = scmp.ne.s32.totalorder %s1137_s17, %s1867_s1  ;;  %p1873_p6 = scmp.lt.s32.totalorder %s1867_s1, %s1867_s1 }
 0x390   :  { %v1043_v62 = vadd.f32 %v1042_v24, %v1041_v6  ;;  %p1874_p7 = por %p1873_p6, %p1872_p5 }
 0x392   :  { %v1044_v63 = vrot.slane %v1043_v62, 1  ;;  %p1875_p8 = pnand %p1874_p7, %p1868_p4 }
 0x394   :  { %v1045_v26 = vadd.f32 %v1044_v63, %v1043_v62 }
 0x396   :  { %v1046_v3 = vmax.f32 %v1045_v26, 1e-24 }
 0x398   :  { %1777 = vrsqrt.f32 %v1046_v3 }
 0x3a2   :  { %v1778_v5 = vpop.eup %1777 }
 0x455   :  { %v1114_v7 = vpop.f32.mrb[8].mxu0 }
 0x456   :  { %v1118_v9 = vmul.f32 %v1778_v5, %v1114_v7  ;;  %v1482_v11 = vpop.f32.mrb[9].mxu0 }
 0x458   :  { %1119 = vst [vmem:[#allocation9] sm:$0xff] %v1118_v9 }
 0x459   :  { %1878 = shalt.err (!%p1875_p8)
}
 0x45a   :  { %s1879_s19 = scalar_lea.hbm %s2181_s5, 128 }
 0x45b   :  { %p1880_p9 = scmp.ne.s32.totalorder %s2181_s5, %s1879_s19  ;;  %p1883_p10 = scmp.lt.u32.totalorder %s1879_s19, %s2181_s5 }
 0x45d   :  { %p1885_p11 = pnand %p1883_p10, %p1880_p9 }
 0x45f   :  { %1888 = shalt.err (!%p1885_p11)
}
 0x460   :  { %1139 = dma.vmem_to_hbm [thread:$0]  %s1137_s17, 128, %s2181_s5, [#allocation10]  }
 0x461   :  { %1893 = dma.done.wait [#allocation4], 128  }
 0x462   :  { %1894 = vsyncadd [#allocation4], 4294967168 }
 0x463   :  { %1895 = dma.done.wait [#allocation10], 128  }
 0x464   :  { %1896 = vsyncadd [#allocation10], 4294967168 }
 0x465   :  { %1146 = vsyncpa [#allocation3], 1 }
 0x466   :  { %1147 = vsyncpa [#allocation6], 1 }
 0x467   :  { %1148 = vsyncpa [#allocation4], 1 }
 0x468   :  { %1149 = vsyncpa [#allocation10], 1 }

</bundles_post_ra>
